<compile_context>
chip_gen: v7x
topology: tpu7x:2x2x1
jax: 0.10.0
libtpu: 0.0.40
codegen_flags: <defaults>
</compile_context>

<pallas_src>
import math
import functools
import numpy as np
import jax
import jax.numpy as jnp
from jax.experimental import pallas as pl
from jax.experimental.pallas import tpu as pltpu

LN_EPS = 1e-5
NEG_INF = -1e9  # additive mask value (stand-in for -inf)


def _layernorm(x, gamma, beta):
    mu = jnp.mean(x, axis=-1, keepdims=True)
    var = jnp.mean((x - mu) ** 2, axis=-1, keepdims=True)
    return (x - mu) / jnp.sqrt(var + LN_EPS) * gamma + beta


def encoder_block_kernel(x_ref, attn_mask_ref, pad_ref,
                         w_in_ref, b_in_ref, w_out_ref, b_out_ref,
                         g1_ref, bt1_ref,
                         w1_ref, b1_ref, w2_ref, b2_ref,
                         g2_ref, bt2_ref,
                         o_ref, *, nhead):
    # x_ref: (BB*L, E)  — BB batch elements folded into this grid step.
    E = x_ref.shape[1]
    L = attn_mask_ref.shape[0]
    bb = pad_ref.shape[0]
    D = E // nhead
    scale = 1.0 / math.sqrt(D)

    x = x_ref[...]                                   # (BB*L, E)

    # additive mask hoisted out of the head loop: (L,L) + (BB,1,L) -> (BB,L,L)
    mask = attn_mask_ref[...] + pad_ref[...]

    # fused QKV projection — weights are pre-transposed (in_features, out_features)
    qkv = jnp.dot(x, w_in_ref[...], preferred_element_type=jnp.float32) + b_in_ref[...]
    w_out = w_out_ref[...]                           # (E, E); rows = concatenated head dims

    # Per-head attention, batched over the folded batch dim. Each head's context is folded
    # directly into the output-projection accumulator (no concat, no scratch).
    attn = jnp.zeros((bb * L, E), dtype=jnp.float32)
    for h in range(nhead):                           # static unroll (nhead is small)
        qh = (qkv[:, h * D:(h + 1) * D] * scale).reshape(bb, L, D)
        kh = qkv[:, E + h * D:E + (h + 1) * D].reshape(bb, L, D)
        vh = qkv[:, 2 * E + h * D:2 * E + (h + 1) * D].reshape(bb, L, D)
        s = jnp.einsum('bld,bmd->blm', qh, kh,
                       preferred_element_type=jnp.float32) + mask       # (BB, L, L)
        m = jnp.max(s, axis=-1, keepdims=True)
        p = jnp.exp(s - m)
        p = p * pl.reciprocal(jnp.sum(p, axis=-1, keepdims=True), approx=True)
        ctx = jnp.einsum('blm,bmd->bld', p, vh,
                         preferred_element_type=jnp.float32)            # (BB, L, D)
        attn = attn + jnp.dot(ctx.reshape(bb * L, D),
                              w_out[h * D:(h + 1) * D, :],
                              preferred_element_type=jnp.float32)
    attn = attn + b_out_ref[...]

    # residual + LayerNorm1 (pre_norm=False -> post-norm; dropout = identity in eval)
    x1 = _layernorm(x + attn, g1_ref[...], bt1_ref[...])

    # feed-forward
    h1 = jnp.maximum(jnp.dot(x1, w1_ref[...], preferred_element_type=jnp.float32)
                     + b1_ref[...], 0.0)
    ff = jnp.dot(h1, w2_ref[...], preferred_element_type=jnp.float32) + b2_ref[...]

    # residual + LayerNorm2
    o_ref[...] = _layernorm(x1 + ff, g2_ref[...], bt2_ref[...]).astype(o_ref.dtype)


def encoder_block(x, attn_mask, padding_mask, params, nhead, batch_block=None):
    B, L, E = x.shape
    F_dim = params["w1"].shape[0]
    bb = B if batch_block is None else batch_block   # batch elements per grid step
    assert B % bb == 0

    # key_padding_mask (bool, True = ignore) -> additive float mask (PyTorch semantics)
    pad_add = jnp.where(padding_mask, NEG_INF, 0.0).astype(jnp.float32).reshape(B, 1, L)

    # Flatten (B,L,E) -> (B*L,E) outside the kernel (free metadata reshape on HBM).
    x2d = x.reshape(B * L, E).astype(jnp.float32)

    # One-time host-side transposes so the kernel never does W.T.
    w_in_t = params["w_in"].T        # (E, 3E)
    w_out_t = params["w_out"].T      # (E, E)
    w1_t = params["w1"].T            # (E, F)
    w2_t = params["w2"].T            # (F, E)

    in_specs = [
        pl.BlockSpec((bb * L, E), lambda b: (b, 0)),      # x (folded batch)
        pl.BlockSpec((L, L), lambda b: (0, 0)),           # attn_mask (additive float)
        pl.BlockSpec((bb, 1, L), lambda b: (b, 0, 0)),    # additive key-padding mask
        pl.BlockSpec((E, 3 * E), lambda b: (0, 0)),       # in_proj_weight^T
        pl.BlockSpec((1, 3 * E), lambda b: (0, 0)),       # in_proj_bias
        pl.BlockSpec((E, E), lambda b: (0, 0)),           # out_proj.weight^T
        pl.BlockSpec((1, E), lambda b: (0, 0)),           # out_proj.bias
        pl.BlockSpec((1, E), lambda b: (0, 0)),           # norm1.weight
        pl.BlockSpec((1, E), lambda b: (0, 0)),           # norm1.bias
        pl.BlockSpec((E, F_dim), lambda b: (0, 0)),       # ff1.weight^T
        pl.BlockSpec((1, F_dim), lambda b: (0, 0)),       # ff1.bias
        pl.BlockSpec((F_dim, E), lambda b: (0, 0)),       # ff2.weight^T
        pl.BlockSpec((1, E), lambda b: (0, 0)),           # ff2.bias
        pl.BlockSpec((1, E), lambda b: (0, 0)),           # norm2.weight
        pl.BlockSpec((1, E), lambda b: (0, 0)),           # norm2.bias
    ]
    kernel = functools.partial(encoder_block_kernel, nhead=nhead)
    out2d = pl.pallas_call(
        kernel,
        out_shape=jax.ShapeDtypeStruct((B * L, E), jnp.float32),
        grid_spec=pltpu.PrefetchScalarGridSpec(
            num_scalar_prefetch=0,
            grid=(B // bb,),
            in_specs=in_specs,
            out_specs=pl.BlockSpec((bb * L, E), lambda b: (b, 0)),
        ),
        compiler_params=pltpu.CompilerParams(dimension_semantics=("parallel",)),
    )(x2d, attn_mask, pad_add,
      w_in_t, params["b_in"], w_out_t, params["b_out"],
      params["g1"], params["bt1"],
      w1_t, params["b1"], w2_t, params["b2"],
      params["g2"], params["bt2"])
    return out2d.reshape(B, L, E)


def reference(x, attn_mask, padding_mask, params, nhead):
    """Pure-JAX reference mirroring the PyTorch forward (eval mode)."""
    B, L, E = x.shape
    D = E // nhead
    pad = jnp.where(padding_mask, NEG_INF, 0.0)[:, None, None, :]
    qkv = x @ params["w_in"].T + params["b_in"]
    q, k, v = jnp.split(qkv, 3, axis=-1)
    sh = lambda t: t.reshape(B, L, nhead, D).transpose(0, 2, 1, 3)
    q, k, v = sh(q) / math.sqrt(D), sh(k), sh(v)
    s = jnp.einsum("bhld,bhmd->bhlm", q, k) + attn_mask[None, None] + pad
    p = jax.nn.softmax(s, axis=-1)
    ctx = jnp.einsum("bhlm,bhmd->bhld", p, v).transpose(0, 2, 1, 3).reshape(B, L, E)
    attn = ctx @ params["w_out"].T + params["b_out"]
    x1 = _layernorm(x + attn, params["g1"], params["bt1"])
    h = jax.nn.relu(x1 @ params["w1"].T + params["b1"])
    x2 = x1 + h @ params["w2"].T + params["b2"]
    return _layernorm(x2, params["g2"], params["bt2"])


if __name__ == "__main__":
    key = jax.random.PRNGKey(0)
    B, L, E, H, FF = 2, 8, 32, 4, 64   # small shapes: nhead=4, ndim=32, ndim_feedforward=64
    ks = jax.random.split(key, 16)
    params = {
        "w_in":  0.05 * jax.random.normal(ks[0], (3 * E, E), jnp.float32),
        "b_in":  0.05 * jax.random.normal(ks[1], (1, 3 * E), jnp.float32),
        "w_out": 0.05 * jax.random.normal(ks[2], (E, E), jnp.float32),
        "b_out": 0.05 * jax.random.normal(ks[3], (1, E), jnp.float32),
        "g1":    1.0 + 0.05 * jax.random.normal(ks[4], (1, E), jnp.float32),
        "bt1":   0.05 * jax.random.normal(ks[5], (1, E), jnp.float32),
        "w1":    0.05 * jax.random.normal(ks[6], (FF, E), jnp.float32),
        "b1":    0.05 * jax.random.normal(ks[7], (1, FF), jnp.float32),
        "w2":    0.05 * jax.random.normal(ks[8], (E, FF), jnp.float32),
        "b2":    0.05 * jax.random.normal(ks[9], (1, E), jnp.float32),
        "g2":    1.0 + 0.05 * jax.random.normal(ks[10], (1, E), jnp.float32),
        "bt2":   0.05 * jax.random.normal(ks[11], (1, E), jnp.float32),
    }
    x = jax.random.normal(ks[12], (B, L, E), jnp.float32)
    attn_mask = 0.1 * jax.random.normal(ks[13], (L, L), jnp.float32)   # float additive attn_mask
    padding_mask = jnp.array(
        [[False, False, False, False, False, False, True, True],
         [False, False, False, False, False, False, False, False]], dtype=bool)  # True = ignore key

    out = encoder_block(x, attn_mask, padding_mask, params, nhead=H)
    jax.block_until_ready(out)

    ref = reference(x, attn_mask, padding_mask, params, H)
    # tolerance relaxed to 2e-3: softmax normalization uses the EUP approx reciprocal.
    np.testing.assert_allclose(np.asarray(out), np.asarray(ref), rtol=2e-3, atol=2e-3)
    print("KERNEL_OK")
</pallas_src>

<mosaic_0001>
module attributes {stable_mosaic.version = 11 : i64} {
  func.func @encoder_block_kernel(%arg0: i32, %arg1: memref<16x32xf32, #tpu.memory_space<vmem>>, %arg2: memref<8x8xf32, #tpu.memory_space<vmem>>, %arg3: memref<2x1x8xf32, #tpu.memory_space<vmem>>, %arg4: memref<32x96xf32, #tpu.memory_space<vmem>>, %arg5: memref<1x96xf32, #tpu.memory_space<vmem>>, %arg6: memref<32x32xf32, #tpu.memory_space<vmem>>, %arg7: memref<1x32xf32, #tpu.memory_space<vmem>>, %arg8: memref<1x32xf32, #tpu.memory_space<vmem>>, %arg9: memref<1x32xf32, #tpu.memory_space<vmem>>, %arg10: memref<32x64xf32, #tpu.memory_space<vmem>>, %arg11: memref<1x64xf32, #tpu.memory_space<vmem>>, %arg12: memref<64x32xf32, #tpu.memory_space<vmem>>, %arg13: memref<1x32xf32, #tpu.memory_space<vmem>>, %arg14: memref<1x32xf32, #tpu.memory_space<vmem>>, %arg15: memref<1x32xf32, #tpu.memory_space<vmem>>, %arg16: memref<16x32xf32, #tpu.memory_space<vmem>>) attributes {dimension_semantics = [#tpu.dimension_semantics<parallel>], iteration_bounds = array<i64: 1>, scalar_prefetch = 0 : i64, scratch_operands = 0 : i64, tpu.core_type = #tpu.core_type<tc>, window_params = [{transform_indices = @transform_0, window_bounds = array<i64: 16, 32>}, {pipeline_mode = #tpu.pipeline_mode<synchronous>, transform_indices = @transform_1, window_bounds = array<i64: 8, 8>}, {transform_indices = @transform_2, window_bounds = array<i64: 2, 1, 8>}, {pipeline_mode = #tpu.pipeline_mode<synchronous>, transform_indices = @transform_3, window_bounds = array<i64: 32, 96>}, {pipeline_mode = #tpu.pipeline_mode<synchronous>, transform_indices = @transform_4, window_bounds = array<i64: 1, 96>}, {pipeline_mode = #tpu.pipeline_mode<synchronous>, transform_indices = @transform_5, window_bounds = array<i64: 32, 32>}, {pipeline_mode = #tpu.pipeline_mode<synchronous>, transform_indices = @transform_6, window_bounds = array<i64: 1, 32>}, {pipeline_mode = #tpu.pipeline_mode<synchronous>, transform_indices = @transform_7, window_bounds = array<i64: 1, 32>}, {pipeline_mode = #tpu.pipeline_mode<synchronous>, transform_indices = @transform_8, window_bounds = array<i64: 1, 32>}, {pipeline_mode = #tpu.pipeline_mode<synchronous>, transform_indices = @transform_9, window_bounds = array<i64: 32, 64>}, {pipeline_mode = #tpu.pipeline_mode<synchronous>, transform_indices = @transform_10, window_bounds = array<i64: 1, 64>}, {pipeline_mode = #tpu.pipeline_mode<synchronous>, transform_indices = @transform_11, window_bounds = array<i64: 64, 32>}, {pipeline_mode = #tpu.pipeline_mode<synchronous>, transform_indices = @transform_12, window_bounds = array<i64: 1, 32>}, {pipeline_mode = #tpu.pipeline_mode<synchronous>, transform_indices = @transform_13, window_bounds = array<i64: 1, 32>}, {pipeline_mode = #tpu.pipeline_mode<synchronous>, transform_indices = @transform_14, window_bounds = array<i64: 1, 32>}, {transform_indices = @transform_15, window_bounds = array<i64: 16, 32>}]} {
    %c0 = arith.constant 0 : index
    %c0_0 = arith.constant 0 : index
    %0 = vector.load %arg1[%c0, %c0_0] : memref<16x32xf32, #tpu.memory_space<vmem>>, vector<16x32xf32>
    %c0_1 = arith.constant 0 : index
    %c0_2 = arith.constant 0 : index
    %1 = vector.load %arg2[%c0_1, %c0_2] : memref<8x8xf32, #tpu.memory_space<vmem>>, vector<8x8xf32>
    %c0_3 = arith.constant 0 : index
    %c0_4 = arith.constant 0 : index
    %c0_5 = arith.constant 0 : index
    %2 = vector.load %arg3[%c0_3, %c0_4, %c0_5] : memref<2x1x8xf32, #tpu.memory_space<vmem>>, vector<2x1x8xf32>
    %3 = vector.shape_cast %1 : vector<8x8xf32> to vector<1x8x8xf32>
    %4 = vector.broadcast %3 : vector<1x8x8xf32> to vector<2x8x8xf32>
    %5 = vector.broadcast %2 : vector<2x1x8xf32> to vector<2x8x8xf32>
    %6 = arith.addf %4, %5 : vector<2x8x8xf32>
    %c0_6 = arith.constant 0 : index
    %c0_7 = arith.constant 0 : index
    %7 = vector.load %arg4[%c0_6, %c0_7] : memref<32x96xf32, #tpu.memory_space<vmem>>, vector<32x96xf32>
    %cst = arith.constant dense<0.000000e+00> : vector<16x96xf32>
    %8 = tpu.matmul %0, %7, %cst {dimension_numbers = #tpu.dot_dimension_numbers<[1], [0], [0], [1], [0, 0, 1, 1], [], []>} : vector<16x32xf32>, vector<32x96xf32>, vector<16x96xf32> -> vector<16x96xf32>
    %c0_8 = arith.constant 0 : index
    %c0_9 = arith.constant 0 : index
    %9 = vector.load %arg5[%c0_8, %c0_9] : memref<1x96xf32, #tpu.memory_space<vmem>>, vector<1x96xf32>
    %10 = vector.broadcast %9 : vector<1x96xf32> to vector<16x96xf32>
    %11 = arith.addf %8, %10 : vector<16x96xf32>
    %c0_10 = arith.constant 0 : index
    %c0_11 = arith.constant 0 : index
    %12 = vector.load %arg6[%c0_10, %c0_11] : memref<32x32xf32, #tpu.memory_space<vmem>>, vector<32x32xf32>
    %cst_12 = arith.constant 0.000000e+00 : f32
    %13 = vector.broadcast %cst_12 : f32 to vector<16x32xf32>
    %14 = vector.extract_strided_slice %11 {offsets = [0, 0], sizes = [16, 8], strides = [1, 1]} : vector<16x96xf32> to vector<16x8xf32>
    %cst_13 = arith.constant 0.353553385 : f32
    %15 = vector.broadcast %cst_13 : f32 to vector<16x8xf32>
    %16 = arith.mulf %14, %15 : vector<16x8xf32>
    %17 = vector.shape_cast %16 : vector<16x8xf32> to vector<2x8x8xf32>
    %18 = vector.extract_strided_slice %11 {offsets = [0, 32], sizes = [16, 8], strides = [1, 1]} : vector<16x96xf32> to vector<16x8xf32>
    %19 = vector.shape_cast %18 : vector<16x8xf32> to vector<2x8x8xf32>
    %20 = vector.extract_strided_slice %11 {offsets = [0, 64], sizes = [16, 8], strides = [1, 1]} : vector<16x96xf32> to vector<16x8xf32>
    %21 = vector.shape_cast %20 : vector<16x8xf32> to vector<2x8x8xf32>
    "tpu.trace_start"() <{level = 10 : i32, message = "bld,bmd->blm"}> : () -> ()
    %cst_14 = arith.constant dense<0.000000e+00> : vector<2x8x8xf32>
    %22 = tpu.matmul %17, %19, %cst_14 {dimension_numbers = #tpu.dot_dimension_numbers<[2], [2], [1], [1], [0, 0, 0, 1, 1, 1], [0], [0]>} : vector<2x8x8xf32>, vector<2x8x8xf32>, vector<2x8x8xf32> -> vector<2x8x8xf32>
    "tpu.trace_stop"() : () -> ()
    %23 = arith.addf %22, %6 : vector<2x8x8xf32>
    %cst_15 = arith.constant dense<0xFF800000> : vector<2x8xf32>
    %24 = vector.multi_reduction <maximumf>, %23, %cst_15 [2] : vector<2x8x8xf32> to vector<2x8xf32>
    %25 = vector.shape_cast %24 : vector<2x8xf32> to vector<2x8x1xf32>
    %26 = vector.broadcast %25 : vector<2x8x1xf32> to vector<2x8x8xf32>
    %27 = arith.subf %23, %26 : vector<2x8x8xf32>
    %28 = math.exp %27 : vector<2x8x8xf32>
    %cst_16 = arith.constant dense<0.000000e+00> : vector<2x8xf32>
    %29 = vector.multi_reduction <add>, %28, %cst_16 [2] : vector<2x8x8xf32> to vector<2x8xf32>
    %30 = vector.shape_cast %29 : vector<2x8xf32> to vector<2x8x1xf32>
    %31 = tpu.reciprocal %30 {approx = true} : vector<2x8x1xf32> -> vector<2x8x1xf32>
    %32 = vector.broadcast %31 : vector<2x8x1xf32> to vector<2x8x8xf32>
    %33 = arith.mulf %28, %32 : vector<2x8x8xf32>
    "tpu.trace_start"() <{level = 10 : i32, message = "blm,bmd->bld"}> : () -> ()
    %cst_17 = arith.constant dense<0.000000e+00> : vector<2x8x8xf32>
    %34 = tpu.matmul %33, %21, %cst_17 {dimension_numbers = #tpu.dot_dimension_numbers<[2], [1], [1], [2], [0, 0, 0, 1, 1, 2], [0], [0]>} : vector<2x8x8xf32>, vector<2x8x8xf32>, vector<2x8x8xf32> -> vector<2x8x8xf32>
    "tpu.trace_stop"() : () -> ()
    %35 = vector.shape_cast %34 : vector<2x8x8xf32> to vector<16x8xf32>
    %36 = vector.extract_strided_slice %12 {offsets = [0, 0], sizes = [8, 32], strides = [1, 1]} : vector<32x32xf32> to vector<8x32xf32>
    %cst_18 = arith.constant dense<0.000000e+00> : vector<16x32xf32>
    %37 = tpu.matmul %35, %36, %cst_18 {dimension_numbers = #tpu.dot_dimension_numbers<[1], [0], [0], [1], [0, 0, 1, 1], [], []>} : vector<16x8xf32>, vector<8x32xf32>, vector<16x32xf32> -> vector<16x32xf32>
    %38 = arith.addf %13, %37 : vector<16x32xf32>
    %39 = vector.extract_strided_slice %11 {offsets = [0, 8], sizes = [16, 8], strides = [1, 1]} : vector<16x96xf32> to vector<16x8xf32>
    %cst_19 = arith.constant 0.353553385 : f32
    %40 = vector.broadcast %cst_19 : f32 to vector<16x8xf32>
    %41 = arith.mulf %39, %40 : vector<16x8xf32>
    %42 = vector.shape_cast %41 : vector<16x8xf32> to vector<2x8x8xf32>
    %43 = vector.extract_strided_slice %11 {offsets = [0, 40], sizes = [16, 8], strides = [1, 1]} : vector<16x96xf32> to vector<16x8xf32>
    %44 = vector.shape_cast %43 : vector<16x8xf32> to vector<2x8x8xf32>
    %45 = vector.extract_strided_slice %11 {offsets = [0, 72], sizes = [16, 8], strides = [1, 1]} : vector<16x96xf32> to vector<16x8xf32>
    %46 = vector.shape_cast %45 : vector<16x8xf32> to vector<2x8x8xf32>
    "tpu.trace_start"() <{level = 10 : i32, message = "bld,bmd->blm"}> : () -> ()
    %cst_20 = arith.constant dense<0.000000e+00> : vector<2x8x8xf32>
    %47 = tpu.matmul %42, %44, %cst_20 {dimension_numbers = #tpu.dot_dimension_numbers<[2], [2], [1], [1], [0, 0, 0, 1, 1, 1], [0], [0]>} : vector<2x8x8xf32>, vector<2x8x8xf32>, vector<2x8x8xf32> -> vector<2x8x8xf32>
    "tpu.trace_stop"() : () -> ()
    %48 = arith.addf %47, %6 : vector<2x8x8xf32>
    %cst_21 = arith.constant dense<0xFF800000> : vector<2x8xf32>
    %49 = vector.multi_reduction <maximumf>, %48, %cst_21 [2] : vector<2x8x8xf32> to vector<2x8xf32>
    %50 = vector.shape_cast %49 : vector<2x8xf32> to vector<2x8x1xf32>
    %51 = vector.broadcast %50 : vector<2x8x1xf32> to vector<2x8x8xf32>
    %52 = arith.subf %48, %51 : vector<2x8x8xf32>
    %53 = math.exp %52 : vector<2x8x8xf32>
    %cst_22 = arith.constant dense<0.000000e+00> : vector<2x8xf32>
    %54 = vector.multi_reduction <add>, %53, %cst_22 [2] : vector<2x8x8xf32> to vector<2x8xf32>
    %55 = vector.shape_cast %54 : vector<2x8xf32> to vector<2x8x1xf32>
    %56 = tpu.reciprocal %55 {approx = true} : vector<2x8x1xf32> -> vector<2x8x1xf32>
    %57 = vector.broadcast %56 : vector<2x8x1xf32> to vector<2x8x8xf32>
    %58 = arith.mulf %53, %57 : vector<2x8x8xf32>
    "tpu.trace_start"() <{level = 10 : i32, message = "blm,bmd->bld"}> : () -> ()
    %cst_23 = arith.constant dense<0.000000e+00> : vector<2x8x8xf32>
    %59 = tpu.matmul %58, %46, %cst_23 {dimension_numbers = #tpu.dot_dimension_numbers<[2], [1], [1], [2], [0, 0, 0, 1, 1, 2], [0], [0]>} : vector<2x8x8xf32>, vector<2x8x8xf32>, vector<2x8x8xf32> -> vector<2x8x8xf32>
    "tpu.trace_stop"() : () -> ()
    %60 = vector.shape_cast %59 : vector<2x8x8xf32> to vector<16x8xf32>
    %61 = vector.extract_strided_slice %12 {offsets = [8, 0], sizes = [8, 32], strides = [1, 1]} : vector<32x32xf32> to vector<8x32xf32>
    %cst_24 = arith.constant dense<0.000000e+00> : vector<16x32xf32>
    %62 = tpu.matmul %60, %61, %cst_24 {dimension_numbers = #tpu.dot_dimension_numbers<[1], [0], [0], [1], [0, 0, 1, 1], [], []>} : vector<16x8xf32>, vector<8x32xf32>, vector<16x32xf32> -> vector<16x32xf32>
    %63 = arith.addf %38, %62 : vector<16x32xf32>
    %64 = vector.extract_strided_slice %11 {offsets = [0, 16], sizes = [16, 8], strides = [1, 1]} : vector<16x96xf32> to vector<16x8xf32>
    %cst_25 = arith.constant 0.353553385 : f32
    %65 = vector.broadcast %cst_25 : f32 to vector<16x8xf32>
    %66 = arith.mulf %64, %65 : vector<16x8xf32>
    %67 = vector.shape_cast %66 : vector<16x8xf32> to vector<2x8x8xf32>
    %68 = vector.extract_strided_slice %11 {offsets = [0, 48], sizes = [16, 8], strides = [1, 1]} : vector<16x96xf32> to vector<16x8xf32>
    %69 = vector.shape_cast %68 : vector<16x8xf32> to vector<2x8x8xf32>
    %70 = vector.extract_strided_slice %11 {offsets = [0, 80], sizes = [16, 8], strides = [1, 1]} : vector<16x96xf32> to vector<16x8xf32>
    %71 = vector.shape_cast %70 : vector<16x8xf32> to vector<2x8x8xf32>
    "tpu.trace_start"() <{level = 10 : i32, message = "bld,bmd->blm"}> : () -> ()
    %cst_26 = arith.constant dense<0.000000e+00> : vector<2x8x8xf32>
    %72 = tpu.matmul %67, %69, %cst_26 {dimension_numbers = #tpu.dot_dimension_numbers<[2], [2], [1], [1], [0, 0, 0, 1, 1, 1], [0], [0]>} : vector<2x8x8xf32>, vector<2x8x8xf32>, vector<2x8x8xf32> -> vector<2x8x8xf32>
    "tpu.trace_stop"() : () -> ()
    %73 = arith.addf %72, %6 : vector<2x8x8xf32>
    %cst_27 = arith.constant dense<0xFF800000> : vector<2x8xf32>
    %74 = vector.multi_reduction <maximumf>, %73, %cst_27 [2] : vector<2x8x8xf32> to vector<2x8xf32>
    %75 = vector.shape_cast %74 : vector<2x8xf32> to vector<2x8x1xf32>
    %76 = vector.broadcast %75 : vector<2x8x1xf32> to vector<2x8x8xf32>
    %77 = arith.subf %73, %76 : vector<2x8x8xf32>
    %78 = math.exp %77 : vector<2x8x8xf32>
    %cst_28 = arith.constant dense<0.000000e+00> : vector<2x8xf32>
    %79 = vector.multi_reduction <add>, %78, %cst_28 [2] : vector<2x8x8xf32> to vector<2x8xf32>
    %80 = vector.shape_cast %79 : vector<2x8xf32> to vector<2x8x1xf32>
    %81 = tpu.reciprocal %80 {approx = true} : vector<2x8x1xf32> -> vector<2x8x1xf32>
    %82 = vector.broadcast %81 : vector<2x8x1xf32> to vector<2x8x8xf32>
    %83 = arith.mulf %78, %82 : vector<2x8x8xf32>
    "tpu.trace_start"() <{level = 10 : i32, message = "blm,bmd->bld"}> : () -> ()
    %cst_29 = arith.constant dense<0.000000e+00> : vector<2x8x8xf32>
    %84 = tpu.matmul %83, %71, %cst_29 {dimension_numbers = #tpu.dot_dimension_numbers<[2], [1], [1], [2], [0, 0, 0, 1, 1, 2], [0], [0]>} : vector<2x8x8xf32>, vector<2x8x8xf32>, vector<2x8x8xf32> -> vector<2x8x8xf32>
    "tpu.trace_stop"() : () -> ()
    %85 = vector.shape_cast %84 : vector<2x8x8xf32> to vector<16x8xf32>
    %86 = vector.extract_strided_slice %12 {offsets = [16, 0], sizes = [8, 32], strides = [1, 1]} : vector<32x32xf32> to vector<8x32xf32>
    %cst_30 = arith.constant dense<0.000000e+00> : vector<16x32xf32>
    %87 = tpu.matmul %85, %86, %cst_30 {dimension_numbers = #tpu.dot_dimension_numbers<[1], [0], [0], [1], [0, 0, 1, 1], [], []>} : vector<16x8xf32>, vector<8x32xf32>, vector<16x32xf32> -> vector<16x32xf32>
    %88 = arith.addf %63, %87 : vector<16x32xf32>
    %89 = vector.extract_strided_slice %11 {offsets = [0, 24], sizes = [16, 8], strides = [1, 1]} : vector<16x96xf32> to vector<16x8xf32>
    %cst_31 = arith.constant 0.353553385 : f32
    %90 = vector.broadcast %cst_31 : f32 to vector<16x8xf32>
    %91 = arith.mulf %89, %90 : vector<16x8xf32>
    %92 = vector.shape_cast %91 : vector<16x8xf32> to vector<2x8x8xf32>
    %93 = vector.extract_strided_slice %11 {offsets = [0, 56], sizes = [16, 8], strides = [1, 1]} : vector<16x96xf32> to vector<16x8xf32>
    %94 = vector.shape_cast %93 : vector<16x8xf32> to vector<2x8x8xf32>
    %95 = vector.extract_strided_slice %11 {offsets = [0, 88], sizes = [16, 8], strides = [1, 1]} : vector<16x96xf32> to vector<16x8xf32>
    %96 = vector.shape_cast %95 : vector<16x8xf32> to vector<2x8x8xf32>
    "tpu.trace_start"() <{level = 10 : i32, message = "bld,bmd->blm"}> : () -> ()
    %cst_32 = arith.constant dense<0.000000e+00> : vector<2x8x8xf32>
    %97 = tpu.matmul %92, %94, %cst_32 {dimension_numbers = #tpu.dot_dimension_numbers<[2], [2], [1], [1], [0, 0, 0, 1, 1, 1], [0], [0]>} : vector<2x8x8xf32>, vector<2x8x8xf32>, vector<2x8x8xf32> -> vector<2x8x8xf32>
    "tpu.trace_stop"() : () -> ()
    %98 = arith.addf %97, %6 : vector<2x8x8xf32>
    %cst_33 = arith.constant dense<0xFF800000> : vector<2x8xf32>
    %99 = vector.multi_reduction <maximumf>, %98, %cst_33 [2] : vector<2x8x8xf32> to vector<2x8xf32>
    %100 = vector.shape_cast %99 : vector<2x8xf32> to vector<2x8x1xf32>
    %101 = vector.broadcast %100 : vector<2x8x1xf32> to vector<2x8x8xf32>
    %102 = arith.subf %98, %101 : vector<2x8x8xf32>
    %103 = math.exp %102 : vector<2x8x8xf32>
    %cst_34 = arith.constant dense<0.000000e+00> : vector<2x8xf32>
    %104 = vector.multi_reduction <add>, %103, %cst_34 [2] : vector<2x8x8xf32> to vector<2x8xf32>
    %105 = vector.shape_cast %104 : vector<2x8xf32> to vector<2x8x1xf32>
    %106 = tpu.reciprocal %105 {approx = true} : vector<2x8x1xf32> -> vector<2x8x1xf32>
    %107 = vector.broadcast %106 : vector<2x8x1xf32> to vector<2x8x8xf32>
    %108 = arith.mulf %103, %107 : vector<2x8x8xf32>
    "tpu.trace_start"() <{level = 10 : i32, message = "blm,bmd->bld"}> : () -> ()
    %cst_35 = arith.constant dense<0.000000e+00> : vector<2x8x8xf32>
    %109 = tpu.matmul %108, %96, %cst_35 {dimension_numbers = #tpu.dot_dimension_numbers<[2], [1], [1], [2], [0, 0, 0, 1, 1, 2], [0], [0]>} : vector<2x8x8xf32>, vector<2x8x8xf32>, vector<2x8x8xf32> -> vector<2x8x8xf32>
    "tpu.trace_stop"() : () -> ()
    %110 = vector.shape_cast %109 : vector<2x8x8xf32> to vector<16x8xf32>
    %111 = vector.extract_strided_slice %12 {offsets = [24, 0], sizes = [8, 32], strides = [1, 1]} : vector<32x32xf32> to vector<8x32xf32>
    %cst_36 = arith.constant dense<0.000000e+00> : vector<16x32xf32>
    %112 = tpu.matmul %110, %111, %cst_36 {dimension_numbers = #tpu.dot_dimension_numbers<[1], [0], [0], [1], [0, 0, 1, 1], [], []>} : vector<16x8xf32>, vector<8x32xf32>, vector<16x32xf32> -> vector<16x32xf32>
    %113 = arith.addf %88, %112 : vector<16x32xf32>
    %c0_37 = arith.constant 0 : index
    %c0_38 = arith.constant 0 : index
    %114 = vector.load %arg7[%c0_37, %c0_38] : memref<1x32xf32, #tpu.memory_space<vmem>>, vector<1x32xf32>
    %115 = vector.broadcast %114 : vector<1x32xf32> to vector<16x32xf32>
    %116 = arith.addf %113, %115 : vector<16x32xf32>
    %117 = arith.addf %0, %116 : vector<16x32xf32>
    %c0_39 = arith.constant 0 : index
    %c0_40 = arith.constant 0 : index
    %118 = vector.load %arg8[%c0_39, %c0_40] : memref<1x32xf32, #tpu.memory_space<vmem>>, vector<1x32xf32>
    %c0_41 = arith.constant 0 : index
    %c0_42 = arith.constant 0 : index
    %119 = vector.load %arg9[%c0_41, %c0_42] : memref<1x32xf32, #tpu.memory_space<vmem>>, vector<1x32xf32>
    %cst_43 = arith.constant dense<0.000000e+00> : vector<16xf32>
    %120 = vector.multi_reduction <add>, %117, %cst_43 [1] : vector<16x32xf32> to vector<16xf32>
    %121 = vector.shape_cast %120 : vector<16xf32> to vector<16x1xf32>
    %cst_44 = arith.constant 3.200000e+01 : f32
    %122 = vector.broadcast %cst_44 : f32 to vector<16x1xf32>
    %123 = arith.divf %121, %122 : vector<16x1xf32>
    %124 = vector.broadcast %123 : vector<16x1xf32> to vector<16x32xf32>
    %125 = arith.subf %117, %124 : vector<16x32xf32>
    %126 = arith.mulf %125, %125 : vector<16x32xf32>
    %cst_45 = arith.constant dense<0.000000e+00> : vector<16xf32>
    %127 = vector.multi_reduction <add>, %126, %cst_45 [1] : vector<16x32xf32> to vector<16xf32>
    %128 = vector.shape_cast %127 : vector<16xf32> to vector<16x1xf32>
    %cst_46 = arith.constant 3.200000e+01 : f32
    %129 = vector.broadcast %cst_46 : f32 to vector<16x1xf32>
    %130 = arith.divf %128, %129 : vector<16x1xf32>
    %131 = vector.broadcast %123 : vector<16x1xf32> to vector<16x32xf32>
    %132 = arith.subf %117, %131 : vector<16x32xf32>
    %cst_47 = arith.constant 9.99999974E-6 : f32
    %133 = vector.broadcast %cst_47 : f32 to vector<16x1xf32>
    %134 = arith.addf %130, %133 : vector<16x1xf32>
    %135 = math.sqrt %134 : vector<16x1xf32>
    %136 = vector.broadcast %135 : vector<16x1xf32> to vector<16x32xf32>
    %137 = arith.divf %132, %136 : vector<16x32xf32>
    %138 = vector.broadcast %118 : vector<1x32xf32> to vector<16x32xf32>
    %139 = arith.mulf %137, %138 : vector<16x32xf32>
    %140 = vector.broadcast %119 : vector<1x32xf32> to vector<16x32xf32>
    %141 = arith.addf %139, %140 : vector<16x32xf32>
    %c0_48 = arith.constant 0 : index
    %c0_49 = arith.constant 0 : index
    %142 = vector.load %arg10[%c0_48, %c0_49] : memref<32x64xf32, #tpu.memory_space<vmem>>, vector<32x64xf32>
    %cst_50 = arith.constant dense<0.000000e+00> : vector<16x64xf32>
    %143 = tpu.matmul %141, %142, %cst_50 {dimension_numbers = #tpu.dot_dimension_numbers<[1], [0], [0], [1], [0, 0, 1, 1], [], []>} : vector<16x32xf32>, vector<32x64xf32>, vector<16x64xf32> -> vector<16x64xf32>
    %c0_51 = arith.constant 0 : index
    %c0_52 = arith.constant 0 : index
    %144 = vector.load %arg11[%c0_51, %c0_52] : memref<1x64xf32, #tpu.memory_space<vmem>>, vector<1x64xf32>
    %145 = vector.broadcast %144 : vector<1x64xf32> to vector<16x64xf32>
    %146 = arith.addf %143, %145 : vector<16x64xf32>
    %cst_53 = arith.constant 0.000000e+00 : f32
    %147 = vector.broadcast %cst_53 : f32 to vector<16x64xf32>
    %148 = arith.maximumf %146, %147 : vector<16x64xf32>
    %c0_54 = arith.constant 0 : index
    %c0_55 = arith.constant 0 : index
    %149 = vector.load %arg12[%c0_54, %c0_55] : memref<64x32xf32, #tpu.memory_space<vmem>>, vector<64x32xf32>
    %cst_56 = arith.constant dense<0.000000e+00> : vector<16x32xf32>
    %150 = tpu.matmul %148, %149, %cst_56 {dimension_numbers = #tpu.dot_dimension_numbers<[1], [0], [0], [1], [0, 0, 1, 1], [], []>} : vector<16x64xf32>, vector<64x32xf32>, vector<16x32xf32> -> vector<16x32xf32>
    %c0_57 = arith.constant 0 : index
    %c0_58 = arith.constant 0 : index
    %151 = vector.load %arg13[%c0_57, %c0_58] : memref<1x32xf32, #tpu.memory_space<vmem>>, vector<1x32xf32>
    %152 = vector.broadcast %151 : vector<1x32xf32> to vector<16x32xf32>
    %153 = arith.addf %150, %152 : vector<16x32xf32>
    %154 = arith.addf %141, %153 : vector<16x32xf32>
    %c0_59 = arith.constant 0 : index
    %c0_60 = arith.constant 0 : index
    %155 = vector.load %arg14[%c0_59, %c0_60] : memref<1x32xf32, #tpu.memory_space<vmem>>, vector<1x32xf32>
    %c0_61 = arith.constant 0 : index
    %c0_62 = arith.constant 0 : index
    %156 = vector.load %arg15[%c0_61, %c0_62] : memref<1x32xf32, #tpu.memory_space<vmem>>, vector<1x32xf32>
    %cst_63 = arith.constant dense<0.000000e+00> : vector<16xf32>
    %157 = vector.multi_reduction <add>, %154, %cst_63 [1] : vector<16x32xf32> to vector<16xf32>
    %158 = vector.shape_cast %157 : vector<16xf32> to vector<16x1xf32>
    %cst_64 = arith.constant 3.200000e+01 : f32
    %159 = vector.broadcast %cst_64 : f32 to vector<16x1xf32>
    %160 = arith.divf %158, %159 : vector<16x1xf32>
    %161 = vector.broadcast %160 : vector<16x1xf32> to vector<16x32xf32>
    %162 = arith.subf %154, %161 : vector<16x32xf32>
    %163 = arith.mulf %162, %162 : vector<16x32xf32>
    %cst_65 = arith.constant dense<0.000000e+00> : vector<16xf32>
    %164 = vector.multi_reduction <add>, %163, %cst_65 [1] : vector<16x32xf32> to vector<16xf32>
    %165 = vector.shape_cast %164 : vector<16xf32> to vector<16x1xf32>
    %cst_66 = arith.constant 3.200000e+01 : f32
    %166 = vector.broadcast %cst_66 : f32 to vector<16x1xf32>
    %167 = arith.divf %165, %166 : vector<16x1xf32>
    %168 = vector.broadcast %160 : vector<16x1xf32> to vector<16x32xf32>
    %169 = arith.subf %154, %168 : vector<16x32xf32>
    %cst_67 = arith.constant 9.99999974E-6 : f32
    %170 = vector.broadcast %cst_67 : f32 to vector<16x1xf32>
    %171 = arith.addf %167, %170 : vector<16x1xf32>
    %172 = math.sqrt %171 : vector<16x1xf32>
    %173 = vector.broadcast %172 : vector<16x1xf32> to vector<16x32xf32>
    %174 = arith.divf %169, %173 : vector<16x32xf32>
    %175 = vector.broadcast %155 : vector<1x32xf32> to vector<16x32xf32>
    %176 = arith.mulf %174, %175 : vector<16x32xf32>
    %177 = vector.broadcast %156 : vector<1x32xf32> to vector<16x32xf32>
    %178 = arith.addf %176, %177 : vector<16x32xf32>
    %c0_68 = arith.constant 0 : index
    %c0_69 = arith.constant 0 : index
    %179 = vector.load %arg16[%c0_68, %c0_69] : memref<16x32xf32, #tpu.memory_space<vmem>>, vector<16x32xf32>
    tpu.vector_store %arg16[%c0_68, %c0_69], %178 {strides = array<i32>} : memref<16x32xf32, #tpu.memory_space<vmem>>, vector<16x32xf32>,
    return
  }
  func.func @transform_0(%arg0: i32) -> (i32, i32) {
    %c0_i32 = arith.constant 0 : i32
    %c0_i32_0 = arith.constant 0 : i32
    return %arg0, %c0_i32 : i32, i32
  }
  func.func @transform_1(%arg0: i32) -> (i32, i32) {
    %c0_i32 = arith.constant 0 : i32
    %c0_i32_0 = arith.constant 0 : i32
    %c0_i32_1 = arith.constant 0 : i32
    return %c0_i32, %c0_i32_0 : i32, i32
  }
  func.func @transform_2(%arg0: i32) -> (i32, i32, i32) {
    %c0_i32 = arith.constant 0 : i32
    %c0_i32_0 = arith.constant 0 : i32
    %c0_i32_1 = arith.constant 0 : i32
    return %arg0, %c0_i32, %c0_i32_0 : i32, i32, i32
  }
  func.func @transform_3(%arg0: i32) -> (i32, i32) {
    %c0_i32 = arith.constant 0 : i32
    %c0_i32_0 = arith.constant 0 : i32
    %c0_i32_1 = arith.constant 0 : i32
    return %c0_i32, %c0_i32_0 : i32, i32
  }
  func.func @transform_4(%arg0: i32) -> (i32, i32) {
    %c0_i32 = arith.constant 0 : i32
    %c0_i32_0 = arith.constant 0 : i32
    %c0_i32_1 = arith.constant 0 : i32
    return %c0_i32, %c0_i32_0 : i32, i32
  }
  func.func @transform_5(%arg0: i32) -> (i32, i32) {
    %c0_i32 = arith.constant 0 : i32
    %c0_i32_0 = arith.constant 0 : i32
    %c0_i32_1 = arith.constant 0 : i32
    return %c0_i32, %c0_i32_0 : i32, i32
  }
  func.func @transform_6(%arg0: i32) -> (i32, i32) {
    %c0_i32 = arith.constant 0 : i32
    %c0_i32_0 = arith.constant 0 : i32
    %c0_i32_1 = arith.constant 0 : i32
    return %c0_i32, %c0_i32_0 : i32, i32
  }
  func.func @transform_7(%arg0: i32) -> (i32, i32) {
    %c0_i32 = arith.constant 0 : i32
    %c0_i32_0 = arith.constant 0 : i32
    %c0_i32_1 = arith.constant 0 : i32
    return %c0_i32, %c0_i32_0 : i32, i32
  }
  func.func @transform_8(%arg0: i32) -> (i32, i32) {
    %c0_i32 = arith.constant 0 : i32
    %c0_i32_0 = arith.constant 0 : i32
    %c0_i32_1 = arith.constant 0 : i32
    return %c0_i32, %c0_i32_0 : i32, i32
  }
  func.func @transform_9(%arg0: i32) -> (i32, i32) {
    %c0_i32 = arith.constant 0 : i32
    %c0_i32_0 = arith.constant 0 : i32
    %c0_i32_1 = arith.constant 0 : i32
    return %c0_i32, %c0_i32_0 : i32, i32
  }
  func.func @transform_10(%arg0: i32) -> (i32, i32) {
    %c0_i32 = arith.constant 0 : i32
    %c0_i32_0 = arith.constant 0 : i32
    %c0_i32_1 = arith.constant 0 : i32
    return %c0_i32, %c0_i32_0 : i32, i32
  }
  func.func @transform_11(%arg0: i32) -> (i32, i32) {
    %c0_i32 = arith.constant 0 : i32
    %c0_i32_0 = arith.constant 0 : i32
    %c0_i32_1 = arith.constant 0 : i32
    return %c0_i32, %c0_i32_0 : i32, i32
  }
  func.func @transform_12(%arg0: i32) -> (i32, i32) {
    %c0_i32 = arith.constant 0 : i32
    %c0_i32_0 = arith.constant 0 : i32
    %c0_i32_1 = arith.constant 0 : i32
    return %c0_i32, %c0_i32_0 : i32, i32
  }
  func.func @transform_13(%arg0: i32) -> (i32, i32) {
    %c0_i32 = arith.constant 0 : i32
    %c0_i32_0 = arith.constant 0 : i32
    %c0_i32_1 = arith.constant 0 : i32
    return %c0_i32, %c0_i32_0 : i32, i32
  }
  func.func @transform_14(%arg0: i32) -> (i32, i32) {
    %c0_i32 = arith.constant 0 : i32
    %c0_i32_0 = arith.constant 0 : i32
    %c0_i32_1 = arith.constant 0 : i32
    return %c0_i32, %c0_i32_0 : i32, i32
  }
  func.func @transform_15(%arg0: i32) -> (i32, i32) {
    %c0_i32 = arith.constant 0 : i32
    %c0_i32_0 = arith.constant 0 : i32
    return %arg0, %c0_i32 : i32, i32
  }
}

</mosaic_0001>

<bundles_post_ra>
// kernel: tpu_custom_call.1
= control target key start
LH: loop header
LB: loop body
LE: loop exit
PB: predicated region body
PF: predicated region fallthrough
CT: control target
= control target key end

     0   :  { %20 = vsyncpa [#allocation3], 0  ;;  %s3024_s0 = inlined_call_operand.hbm [shape: f32[16,32], index: 0, kind: input, shape index: {}]   ;;  %s3025_s1 = inlined_call_operand.hbm [shape: f32[8,8], index: 1, kind: input, shape index: {}]   ;;  %s3026_s2 = inlined_call_operand.vmem [shape: f32[2,1,8], index: 2, kind: input, shape index: {}]   ;;  %s3027_s3 = inlined_call_operand.vmem [shape: f32[32,96], index: 3, kind: input, shape index: {}]   ;;  %s3028_s4 = inlined_call_operand.vmem [shape: f32[1,96], index: 4, kind: input, shape index: {}]   ;;  %s3029_s5 = inlined_call_operand.vmem [shape: f32[32,32], index: 5, kind: input, shape index: {}]   ;;  %s3030_s6 = inlined_call_operand.vmem [shape: f32[1,32], index: 6, kind: input, shape index: {}]   ;;  %s3031_s7 = inlined_call_operand.vmem [shape: f32[1,32], index: 7, kind: input, shape index: {}]   ;;  %s3032_s8 = inlined_call_operand.vmem [shape: f32[1,32], index: 8, kind: input, shape index: {}]   ;;  %s3033_s9 = inlined_call_operand.vmem [shape: f32[32,64], index: 9, kind: input, shape index: {}]   ;;  %s3034_s10 = inlined_call_operand.vmem [shape: f32[1,64], index: 10, kind: input, shape index: {}]   ;;  %s3035_s11 = inlined_call_operand.vmem [shape: f32[64,32], index: 11, kind: input, shape index: {}]   ;;  %s3036_s12 = inlined_call_operand.vmem [shape: f32[1,32], index: 12, kind: input, shape index: {}]   ;;  %s3037_s13 = inlined_call_operand.vmem [shape: f32[1,32], index: 13, kind: input, shape index: {}]   ;;  %s3038_s14 = inlined_call_operand.vmem [shape: f32[1,32], index: 14, kind: input, shape index: {}]   ;;  %s3039_s15 = inlined_call_operand.hbm [shape: f32[16,32], index: 15, kind: output, shape index: {}]  }
   0x1   :  { %21 = vsyncpa [#allocation6], 0 }
   0x2   :  { %22 = vsyncpa [#allocation4], 0  ;;  %s2616_s18 = smov [#allocation2]   ;;  %s2544_s22 = scalar_lea.hbm %s3024_s0, 256 }
   0x3   :  { %s28_s19 = sshll.u32 %s2616_s18, 4  ;;  %p2545_p0 = scmp.ne.s32.totalorder %s3024_s0, %s2544_s22  ;;  %s29_s19 = int_to_ptr.vmem [resolvable:$true] %s28_s19 }
   0x4   :  { %p2548_p1 = scmp.lt.u32.totalorder %s2544_s22, %s3024_s0 }
   0x6   :  { %p2550_p2 = pnand %p2548_p1, %p2545_p0 }
   0x8   :  { %2553 = shalt.err (!%p2550_p2)
}
   0x9   :  { %s2554_s27 = scalar_lea.vmem %s29_s19, 256  ;;  %p2559_p4 = scmp.lt.s32.totalorder %s29_s19, %s29_s19 }
   0xa   :  { %p2555_p3 = scmp.ne.s32.totalorder %s29_s19, %s2554_s27  ;;  %p2560_p5 = scmp.lt.s32.totalorder %s2554_s27, %s2554_s27 }
   0xc   :  { %p2561_p6 = por %p2560_p5, %p2559_p4 }
   0xe   :  { %p2562_p7 = pnand %p2561_p6, %p2555_p3 }
  0x10   :  { %2565 = shalt.err (!%p2562_p7)
}
  0x11   :  { %s2617_s28 = smov 128   ;;  %s2618_s29 = smov 8  }
  0x12   :  { %34 = dma.hbm_to_vmem [thread:$0]  %s3024_s0, 256, %s29_s19, [#allocation3], %s2617_s28, %s2617_s28, %s2618_s29  }
  0x13   :  { %s2619_s17 = smov [#allocation5]   ;;  %s2566_s22 = scalar_lea.hbm %s3025_s1, 128 }
  0x14   :  { %s41_s18 = sshll.u32 %s2619_s17, 4  ;;  %p2567_p8 = scmp.ne.s32.totalorder %s3025_s1, %s2566_s22  ;;  %s42_s18 = int_to_ptr.vmem [resolvable:$true] %s41_s18 }
  0x15   :  { %p2570_p9 = scmp.lt.u32.totalorder %s2566_s22, %s3025_s1 }
  0x17   :  { %p2572_p10 = pnand %p2570_p9, %p2567_p8 }
  0x19   :  { %2575 = shalt.err (!%p2572_p10)
}
  0x1a   :  { %s2576_s27 = scalar_lea.vmem %s42_s18, 128  ;;  %p2581_p12 = scmp.lt.s32.totalorder %s42_s18, %s42_s18 }
  0x1b   :  { %p2577_p11 = scmp.ne.s32.totalorder %s42_s18, %s2576_s27  ;;  %p2582_p13 = scmp.lt.s32.totalorder %s2576_s27, %s2576_s27 }
  0x1d   :  { %p2583_p0 = por %p2582_p13, %p2581_p12 }
  0x1f   :  { %p2584_p1 = pnand %p2583_p0, %p2577_p11 }
  0x21   :  { %2587 = shalt.err (!%p2584_p1)
}
  0x22   :  { %44 = dma.hbm_to_vmem [thread:$0]  %s3025_s1, 128, %s42_s18, [#allocation6]  }
  0x23   :  { %2610 = dma.done.wait [#allocation3], 256  }
  0x24   :  { %2611 = vsyncadd [#allocation3], 4294967040 }
  0x25   :  { %2612 = dma.done.wait [#allocation6], 128  }
  0x26   :  { %2613 = vsyncadd [#allocation6], 4294967168  ;;  %vm107_vm0 = vcmask 261120   ;;  %v96_v0 = vld [vmem:[%s3027_s3] sm:$0xff]  ;;  %v97_v1 = vld [vmem:[%s3027_s3 + $0x8] sm:$0xff]  ;;  %v2620_v8 = vmov 0.0  }
  0x27   :  { %v98_v2 = vld [vmem:[%s3027_s3 + $0x10] sm:$0xff]  ;;  %v2440_v3 = vpack.c.bf16 %v97_v1, %v96_v0  ;;  %v99_v4 = vld [vmem:[%s3027_s3 + $0x18] sm:$0xff]  ;;  %v2753_v5 = vld [vmem:[#allocation2] sm:$0xff]  ;;  %2320 = vmatprep.subr.mxu0 %v2620_v8  ;;  %vm2621_vm1 = vmmov 0   ;;  %s2622_s24 = smov 96   ;;  %s2623_s25 = smov 64  }
  0x28   :  { %v2444_v6 = vpack.c.bf16 %v99_v4, %v98_v2  ;;  %2307 = vmatprep.mubr.msk.f32.mxu1 %vm107_vm0, %v2753_v5  ;;  %v2757_v7 = vld [vmem:[#allocation2 + $0x8] sm:$0xff]  ;;  %2322 = vmatprep.mubr.msk.f32.mxu0 %vm2621_vm1, %v2620_v8  ;;  %v2187_v9 = vld [vmem:[%s3028_s4] ss:$0 sm:$0xff]  ;;  %s2624_s26 = smov 120   ;;  %vm198_vm2 = vcmask 64512   ;;  %v79_v19 = vld [vmem:[#allocation5] sm:$0xff] }
  0x29   :  { %2441 = vmatprep.subr.bf16.mxu1 %v2440_v3  ;;  %v2185_v20 = vld [vmem:[%s3026_s2] ss:$0 sm:$0xff]  ;;  %v2186_v22 = vld [vmem:[%s3026_s2 + $0x1] ss:$0 sm:$0xff]  ;;  %s2625_s2 = smov 88   ;;  %s2626_s30 = smov 80  }
  0x2a   :  { %2443 = vmatpush3.bf16.msra.mxu1 %v2440_v3  ;;  %v2802_v21 = vadd.f32 %v2185_v20, %v79_v19  ;;  %v2808_v26 = vadd.f32 %v2186_v22, %v79_v19  ;;  %s2627_s16 = smov 56   ;;  %s2628_s17 = smov 112   ;;  %vm2023_vm7 = vcmask 523264  }
  0x2b   :  { %2445 = vmatprep.subr.bf16.mxu1 %v2444_v6  ;;  %s2629_s20 = smov 48   ;;  %s2630_s21 = smov 72  }
  0x2c   :  { %s2631_s22 = smov 104   ;;  %s2633_s1 = smov [#allocation7]  }
  0x2d   :  { %s2172_s3 = sshll.u32 %s2633_s1, 4  ;;  %s2173_s3 = int_to_ptr.vmem [resolvable:$true] %s2172_s3 }
  0x2e   :  { %2447 = vmatpush3.bf16.msra.mxu1 %v2444_v6  ;;  %s2588_s18 = scalar_lea.vmem %s2173_s3, 256  ;;  %p2593_p3 = scmp.lt.s32.totalorder %s2173_s3, %s2173_s3 }
  0x2f   :  { %2310 = vmatprep.subr.mxu1 %v2620_v8  ;;  %p2589_p2 = scmp.ne.s32.totalorder %s2173_s3, %s2588_s18  ;;  %p2594_p4 = scmp.lt.s32.totalorder %s2588_s18, %s2588_s18 }
  0x31   :  { %2308 = vmatmul.mubr.msk.f32.vlgmr.msra.gmra.mrb[0].mxu1 %vm107_vm0, %v2757_v7  ;;  %p2595_p5 = por %p2594_p4, %p2593_p3 }
  0x32   :  { %2312 = vmatprep.mubr.msk.f32.mxu1 %vm2621_vm1, %v2620_v8 }
  0x33   :  { %p2596_p6 = pnand %p2595_p5, %p2589_p2 }
 0x104   :  { %v2309_v10 = vpop.f32.mrb[0].mxu1 }
 0x105   :  { %v180_v11 = vpop.f32.mrb[1].mxu1  ;;  %v2773_v13 = vadd.f32 %v2309_v10, %v2187_v9 }
 0x106   :  { %v2770_v12 = vadd.f32 %v2187_v9, %v180_v11 }
 0x107   :  { %v2779_v14 = vmul.f32 0.35355338, %v2773_v13 }
 0x108   :  { %196 = vrot.lane.b32.xlu0 %v2770_v12, %s2622_s24  ;;  %v2786_v16 = vmul.f32 0.35355338, %v2770_v12 }
 0x10c   :  { %275 = vrot.lane.b32.xlu0 %v2773_v13, %s2622_s24 }
 0x110   :  { %450 = vrot.lane.b32.xlu0 %v2773_v13, %s2623_s25 }
 0x114   :  { %604 = vrot.lane.b32.xlu0 %v2779_v14, %s2624_s26 }
 0x17a   :  { %v197_v15 = vpop.permute.xlu0 %196 }
 0x17b   :  { %2311 = vmatpush3.xpose.msk.msra.mxu1 %vm198_vm2, %v197_v15 }
 0x17c   :  { %2315 = vmatprep.subr.mxu1 %v2620_v8 }
 0x17e   :  { %v276_v17 = vpop.permute.xlu0 %275  ;;  %2313 = vmatmul.mubr.msk.f32.vlgmr.msra.gmra.mrb[2].mxu1 %vm198_vm2, %v2786_v16 }
 0x17f   :  { %2316 = vmatpush3.xpose.msk.msra.mxu1 %vm198_vm2, %v276_v17  ;;  %2317 = vmatprep.mubr.msk.f32.mxu1 %vm2621_vm1, %v2620_v8 }
 0x180   :  { %2325 = vmatprep.subr.mxu1 %v2620_v8 }
 0x182   :  { %v451_v18 = vpop.permute.xlu0 %450  ;;  %2318 = vmatmul.mubr.msk.f32.vlgmr.msra.gmra.mrb[4].mxu1 %vm198_vm2, %v2779_v14 }
 0x183   :  { %2326 = vmatpush3.msra.mxu1 %v451_v18  ;;  %2327 = vmatprep.mubr.msk.f32.mxu1 %vm2621_vm1, %v2620_v8 }
 0x184   :  { %2335 = vmatprep.subr.mxu1 %v2620_v8 }
 0x186   :  { %v605_v32 = vpop.permute.xlu0 %604 }
 0x251   :  { %v270_v23 = vpop.f32.mrb[2].mxu1 }
 0x252   :  { %v271_v24 = vadd.f32 %v270_v23, %v2802_v21  ;;  %v2314_v25 = vpop.f32.mrb[3].mxu1 }
 0x254   :  { %v352_v27 = vsel %vm198_vm2, %v271_v24, -inf }
 0x255   :  { %353 = vmax.xlane.f32.xlu0 %v352_v27  ;;  %v348_v28 = vpop.f32.mrb[4].mxu1 }
 0x256   :  { %v349_v29 = vadd.f32 %v348_v28, %v2808_v26  ;;  %v2319_v30 = vpop.f32.mrb[5].mxu1 }
 0x257   :  { %v190_v30 = vld [vmem:[%s3029_s5 + $0x8] sm:$0xff] }
 0x258   :  { %v355_v31 = vsel %vm198_vm2, %v349_v29, -inf }
 0x259   :  { %356 = vmax.xlane.f32.xlu1 %v355_v31  ;;  %v189_v31 = vld [vmem:[%s3029_s5] sm:$0xff] }
 0x26b   :  { %374 = vrot.lane.b32.xlu0 %v2770_v12, %s2623_s25 }
 0x26f   :  { %526 = vrot.lane.b32.xlu0 %v2786_v16, %s2624_s26  ;;  %s2632_s26 = smov 40  }
 0x2e2   :  { %v354_v33 = vpop.xlane.xlu0 %353 }
 0x2e3   :  { %v358_v40 = vsub.f32 %v271_v24, %v354_v33 }
 0x2e5   :  { %v360_v41 = vmul.f32 1.442695, %v358_v40 }
 0x2e6   :  { %v375_v34 = vpop.permute.xlu0 %374  ;;  %v357_v35 = vpop.xlane.xlu1 %356 }
 0x2e7   :  { %v359_v36 = vsub.f32 %v349_v29, %v357_v35  ;;  %2321 = vmatpush3.msra.mxu0 %v375_v34 }
 0x2e8   :  { %2330 = vmatprep.subr.mxu0 %v2620_v8 }
 0x2e9   :  { %v362_v37 = vmul.f32 1.442695, %v359_v36 }
 0x2ea   :  { %v527_v52 = vpop.permute.xlu0 %526 }
 0x2eb   :  { %2496 = vpow2.f32 %v362_v37 }
 0x2ec   :  { %2498 = vpow2.f32 %v360_v41 }
 0x2f5   :  { %v2497_v38 = vpop.eup %2496 }
 0x2f6   :  { %v367_v39 = vsel %vm198_vm2, %v2497_v38, 0.0  ;;  %v2499_v42 = vpop.eup %2498 }
 0x2f7   :  { %368 = vadd.xlane.f32.xlu1 %v367_v39  ;;  %v364_v43 = vsel %vm198_vm2, %v2499_v42, 0.0 }
 0x308   :  { %606 = vrot.lane.b32.xlu1 %v2773_v13, %s2625_s2 }
 0x32c   :  { %365 = vadd.xlane.f32.xlu1 %v364_v43 }
 0x33d   :  { %528 = vrot.lane.b32.xlu1 %v2770_v12, %s2625_s2 }
 0x341   :  { %1020 = vrot.lane.b32.xlu1 %v2770_v12, %s2626_s30 }
 0x384   :  { %v369_v44 = vpop.xlane.xlu1 %368 }
 0x385   :  { %2500 = vrcp.f32 %v369_v44 }
 0x388   :  { %v607_v47 = vpop.permute.xlu1 %606 }
 0x38f   :  { %v2501_v45 = vpop.eup %2500 }
 0x390   :  { %v373_v46 = vmul.f32 %v2501_v45, %v2497_v38 }
 0x392   :  { %2328 = vmatmul.mubr.msk.f32.vlgmr.msra.gmra.mrb[6].mxu1 %vm198_vm2, %v373_v46 }
 0x393   :  { %2336 = vmatpush3.xpose.msk.msra.mxu1 %vm198_vm2, %v607_v47  ;;  %2337 = vmatprep.mubr.msk.f32.mxu1 %vm2621_vm1, %v2620_v8 }
 0x394   :  { %2345 = vmatprep.subr.mxu1 %v2620_v8 }
 0x396   :  { %2338 = vmatmul.mubr.msk.f32.vlgmr.msra.gmra.mrb[8].mxu1 %vm198_vm2, %v605_v32 }
 0x397   :  { %2347 = vmatprep.mubr.msk.f32.mxu1 %vm2621_vm1, %v2620_v8 }
 0x3b9   :  { %v366_v48 = vpop.xlane.xlu1 %365 }
 0x3ba   :  { %2502 = vrcp.f32 %v366_v48 }
 0x3bd   :  { %v529_v51 = vpop.permute.xlu1 %528 }
 0x3c1   :  { %v1021_v22 = vpop.permute.xlu1 %1020 }
 0x3c4   :  { %v2503_v49 = vpop.eup %2502 }
 0x3c5   :  { %v372_v50 = vmul.f32 %v2503_v49, %v2499_v42 }
 0x3c7   :  { %2323 = vmatmul.mubr.msk.f32.vlgmr.msra.gmra.mrb[0].mxu0 %vm198_vm2, %v372_v50 }
 0x3c8   :  { %2331 = vmatpush3.xpose.msk.msra.mxu0 %vm198_vm2, %v529_v51  ;;  %2332 = vmatprep.mubr.msk.f32.mxu0 %vm2621_vm1, %v2620_v8 }
 0x3c9   :  { %2340 = vmatprep.subr.mxu0 %v2620_v8 }
 0x3cb   :  { %2333 = vmatmul.mubr.msk.f32.vlgmr.msra.gmra.mrb[2].mxu0 %vm198_vm2, %v527_v52 }
 0x3cc   :  { %2342 = vmatprep.mubr.msk.f32.mxu0 %vm2621_vm1, %v2620_v8 }
 0x465   :  { %v2840_v53 = vpop.f32.mrb[6].mxu1 }
 0x466   :  { %v2329_v54 = vpop.f32.mrb[7].mxu1 }
 0x469   :  { %v678_v55 = vpop.f32.mrb[8].mxu1 }
 0x46a   :  { %v679_v56 = vadd.f32 %v678_v55, %v2808_v26  ;;  %v2339_v57 = vpop.f32.mrb[9].mxu1 }
 0x46c   :  { %v685_v58 = vsel %vm198_vm2, %v679_v56, -inf }
 0x46d   :  { %686 = vmax.xlane.f32.xlu0 %v685_v58 }
 0x483   :  { %780 = vrot.lane.b32.xlu0 %v2773_v13, %s2627_s16 }
 0x487   :  { %1018 = vrot.lane.b32.xlu0 %v2786_v16, %s2628_s17 }
 0x48b   :  { %1098 = vrot.lane.b32.xlu0 %v2773_v13, %s2626_s30 }
 0x49a   :  { %v2848_v59 = vpop.f32.mrb[0].mxu0 }
 0x49b   :  { %v2324_v60 = vpop.f32.mrb[1].mxu0 }
 0x49e   :  { %v600_v61 = vpop.f32.mrb[2].mxu0 }
 0x49f   :  { %v2334_v62 = vpop.f32.mrb[3].mxu0  ;;  %v601_v63 = vadd.f32 %v600_v61, %v2802_v21 }
 0x4a1   :  { %v682_v0 = vsel %vm198_vm2, %v601_v63, -inf }
 0x4aa   :  { %683 = vmax.xlane.f32.xlu0 %v682_v0 }
 0x4c0   :  { %704 = vrot.lane.b32.xlu0 %v2770_v12, %s2627_s16 }
 0x4c4   :  { %1196 = vrot.lane.b32.xlu0 %v2770_v12, %s2629_s20 }
 0x4c8   :  { %1433 = vrot.lane.b32.xlu0 %v2770_v12, %s2630_s21 }
 0x4cc   :  { %1511 = vrot.lane.b32.xlu0 %v2773_v13, %s2630_s21 }
 0x4d0   :  { %1431 = vrot.lane.b32.xlu0 %v2786_v16, %s2631_s22 }
 0x4d4   :  { %1509 = vrot.lane.b32.xlu0 %v2779_v14, %s2631_s22 }
 0x4fa   :  { %v687_v1 = vpop.xlane.xlu0 %686 }
 0x4fb   :  { %v689_v2 = vsub.f32 %v679_v56, %v687_v1 }
 0x4fd   :  { %v692_v3 = vmul.f32 1.442695, %v689_v2 }
 0x4fe   :  { %v781_v4 = vpop.permute.xlu0 %780 }
 0x4ff   :  { %2504 = vpow2.f32 %v692_v3  ;;  %2346 = vmatpush3.msra.mxu1 %v781_v4 }
 0x500   :  { %2360 = vmatprep.subr.mxu1 %v2620_v8 }
 0x502   :  { %v1019_v10 = vpop.permute.xlu0 %1018 }
 0x506   :  { %v1099_v11 = vpop.permute.xlu0 %1098 }
 0x509   :  { %v2505_v6 = vpop.eup %2504 }
 0x50a   :  { %v697_v9 = vsel %vm198_vm2, %v2505_v6, 0.0 }
 0x50b   :  { %698 = vadd.xlane.f32.xlu1 %v697_v9 }
 0x51c   :  { %1096 = vrot.lane.b32.xlu1 %v2779_v14, %s2628_s17 }
 0x537   :  { %v684_v15 = vpop.xlane.xlu0 %683 }
 0x538   :  { %v688_v16 = vsub.f32 %v601_v63, %v684_v15 }
 0x53a   :  { %v690_v17 = vmul.f32 1.442695, %v688_v16 }
 0x53b   :  { %v705_v18 = vpop.permute.xlu0 %704 }
 0x53c   :  { %2506 = vpow2.f32 %v690_v17  ;;  %2341 = vmatpush3.msra.mxu0 %v705_v18 }
 0x53d   :  { %2350 = vmatprep.subr.mxu0 %v190_v30 }
 0x53f   :  { %v1197_v44 = vpop.permute.xlu0 %1196 }
 0x546   :  { %v2507_v19 = vpop.eup %2506 }
 0x547   :  { %v694_v20 = vsel %vm198_vm2, %v2507_v19, 0.0 }
 0x548   :  { %695 = vadd.xlane.f32.xlu1 %v694_v20 }
 0x598   :  { %v699_v23 = vpop.xlane.xlu1 %698 }
 0x599   :  { %2508 = vrcp.f32 %v699_v23 }
 0x59c   :  { %v1097_v14 = vpop.permute.xlu1 %1096 }
 0x5a3   :  { %v2509_v24 = vpop.eup %2508 }
 0x5a4   :  { %v703_v25 = vmul.f32 %v2509_v24, %v2505_v6 }
 0x5a6   :  { %2348 = vmatmul.mubr.msk.f32.vlgmr.msra.gmra.mrb[10].mxu1 %vm198_vm2, %v703_v25 }
 0x5a7   :  { %2361 = vmatpush3.xpose.msk.msra.mxu1 %vm198_vm2, %v1021_v22  ;;  %2362 = vmatprep.mubr.msk.f32.mxu1 %vm2621_vm1, %v2620_v8 }
 0x5a8   :  { %2365 = vmatprep.subr.mxu1 %v2620_v8 }
 0x5aa   :  { %2363 = vmatmul.mubr.msk.f32.vlgmr.msra.gmra.mrb[12].mxu1 %vm198_vm2, %v1019_v10 }
 0x5ab   :  { %2366 = vmatpush3.xpose.msk.msra.mxu1 %vm198_vm2, %v1099_v11  ;;  %2367 = vmatprep.mubr.msk.f32.mxu1 %vm2621_vm1, %v2620_v8 }
 0x5ac   :  { %2375 = vmatprep.subr.mxu1 %v2620_v8 }
 0x5ae   :  { %2368 = vmatmul.mubr.msk.f32.vlgmr.msra.gmra.mrb[14].mxu1 %vm198_vm2, %v1097_v14 }
 0x5af   :  { %2377 = vmatprep.mubr.msk.f32.mxu1 %vm2621_vm1, %v2620_v8 }
 0x5d5   :  { %v696_v27 = vpop.xlane.xlu1 %695 }
 0x5d6   :  { %2510 = vrcp.f32 %v696_v27 }
 0x5e0   :  { %v2511_v28 = vpop.eup %2510 }
 0x5e1   :  { %v702_v29 = vmul.f32 %v2511_v28, %v2507_v19 }
 0x5e3   :  { %2343 = vmatmul.mubr.msk.f32.vlgmr.msra.gmra.mrb[4].mxu0 %vm198_vm2, %v702_v29 }
 0x5e4   :  { %2351 = vmatpush3.msra.mxu0 %v190_v30 }
 0x5e5   :  { %2355 = vmatprep.subr.mxu0 %v189_v31 }
 0x679   :  { %v852_v32 = vpop.f32.mrb[10].mxu1 }
 0x67a   :  { %v2349_v33 = vpop.f32.mrb[11].mxu1 }
 0x67d   :  { %v1092_v34 = vpop.f32.mrb[12].mxu1 }
 0x67e   :  { %v1093_v35 = vadd.f32 %v1092_v34, %v2802_v21  ;;  %v2364_v36 = vpop.f32.mrb[13].mxu1 }
 0x680   :  { %v1174_v37 = vsel %vm198_vm2, %v1093_v35, -inf }
 0x681   :  { %1175 = vmax.xlane.f32.xlu1 %v1174_v37  ;;  %v1170_v38 = vpop.f32.mrb[14].mxu1 }
 0x682   :  { %v1171_v39 = vadd.f32 %v1170_v38, %v2808_v26  ;;  %v2369_v40 = vpop.f32.mrb[15].mxu1 }
 0x683   :  { %v2222_v40 = vld [vmem:[%s3030_s6] ss:$0 sm:$0xff] }
 0x684   :  { %v1177_v41 = vsel %vm198_vm2, %v1171_v39, -inf }
 0x685   :  { %1178 = vmax.xlane.f32.xlu1 %v1177_v41 }
 0x6b6   :  { %v776_v42 = vpop.f32.mrb[4].mxu0 }
 0x6b7   :  { %v2344_v43 = vpop.f32.mrb[5].mxu0  ;;  %2352 = vmatprep.mubr.msk.f32.mxu0 %vm198_vm2, %v776_v42 }
 0x6b8   :  { %2353 = vmatmul.mubr.msk.f32.vlgmr.msra.gmra.mrb[6].mxu0 %vm198_vm2, %v852_v32 }
 0x6b9   :  { %2357 = vmatprep.mubr.msk.f32.mxu0 %vm198_vm2, %v2848_v59  ;;  %2356 = vmatpush3.msra.mxu0 %v189_v31  ;;  %v1434_v59 = vpop.permute.xlu0 %1433 }
 0x6ba   :  { %2370 = vmatprep.subr.mxu0 %v2620_v8 }
 0x6bd   :  { %v1512_v63 = vpop.permute.xlu0 %1511 }
 0x6c0   :  { %2358 = vmatmul.mubr.msk.f32.vlgmr.msra.gmra.mrb[6].mxu0 %vm198_vm2, %v2840_v53  ;;  %v191_v53 = vld [vmem:[%s3029_s5 + $0x10] sm:$0xff] }
 0x6c1   :  { %2371 = vmatpush3.msra.mxu0 %v1197_v44  ;;  %2372 = vmatprep.mubr.msk.f32.mxu0 %vm2621_vm1, %v2620_v8  ;;  %v1432_v1 = vpop.permute.xlu0 %1431 }
 0x6c2   :  { %2380 = vmatprep.subr.mxu0 %v191_v53 }
 0x6c5   :  { %v1510_v9 = vpop.permute.xlu0 %1509 }
 0x70e   :  { %v1176_v45 = vpop.xlane.xlu1 %1175 }
 0x70f   :  { %v1180_v46 = vsub.f32 %v1093_v35, %v1176_v45 }
 0x711   :  { %v1182_v47 = vmul.f32 1.442695, %v1180_v46 }
 0x712   :  { %v1179_v48 = vpop.xlane.xlu1 %1178 }
 0x713   :  { %2512 = vpow2.f32 %v1182_v47  ;;  %v1181_v49 = vsub.f32 %v1171_v39, %v1179_v48 }
 0x715   :  { %v1184_v50 = vmul.f32 1.442695, %v1181_v49 }
 0x717   :  { %2514 = vpow2.f32 %v1184_v50 }
 0x71d   :  { %v2513_v51 = vpop.eup %2512 }
 0x71e   :  { %v1186_v52 = vsel %vm198_vm2, %v2513_v51, 0.0 }
 0x71f   :  { %1187 = vadd.xlane.f32.xlu1 %v1186_v52 }
 0x721   :  { %v2515_v54 = vpop.eup %2514 }
 0x722   :  { %v1189_v55 = vsel %vm198_vm2, %v2515_v54, 0.0 }
 0x723   :  { %1190 = vadd.xlane.f32.xlu1 %v1189_v55 }
 0x734   :  { %1272 = vrot.lane.b32.xlu1 %v2773_v13, %s2629_s20 }
 0x7ac   :  { %v1188_v56 = vpop.xlane.xlu1 %1187 }
 0x7ad   :  { %2516 = vrcp.f32 %v1188_v56 }
 0x7b0   :  { %v1191_v57 = vpop.xlane.xlu1 %1190 }
 0x7b1   :  { %2518 = vrcp.f32 %v1191_v57 }
 0x7b4   :  { %v1273_v58 = vpop.permute.xlu1 %1272 }
 0x7b5   :  { %2376 = vmatpush3.msra.mxu1 %v1273_v58  ;;  %v1915_v58 = vld [vmem:[%s3033_s9 + $0x8] sm:$0xff] }
 0x7b6   :  { %2385 = vmatprep.subr.mxu1 %v2620_v8 }
 0x7b7   :  { %v2517_v60 = vpop.eup %2516 }
 0x7b8   :  { %v1194_v61 = vmul.f32 %v2517_v60, %v2513_v51 }
 0x7ba   :  { %2373 = vmatmul.mubr.msk.f32.vlgmr.msra.gmra.mrb[8].mxu0 %vm198_vm2, %v1194_v61  ;;  %v1917_v61 = vld [vmem:[%s3033_s9 + $0x18] sm:$0xff] }
 0x7bb   :  { %v2519_v62 = vpop.eup %2518  ;;  %2381 = vmatpush3.msra.mxu0 %v191_v53 }
 0x7bc   :  { %v1195_v0 = vmul.f32 %v2519_v62, %v2515_v54  ;;  %2390 = vmatprep.subr.mxu0 %v2620_v8 }
 0x7be   :  { %2378 = vmatmul.mubr.msk.f32.vlgmr.msra.gmra.mrb[16].mxu1 %vm198_vm2, %v1195_v0  ;;  %v2009_v0 = vld [vmem:[%s3035_s11 + $0x8] sm:$0xff] }
 0x7bf   :  { %2386 = vmatpush3.xpose.msk.msra.mxu1 %vm198_vm2, %v1434_v59  ;;  %2387 = vmatprep.mubr.msk.f32.mxu1 %vm2621_vm1, %v2620_v8  ;;  %v1916_v59 = vld [vmem:[%s3033_s9 + $0x10] sm:$0xff] }
 0x7c0   :  { %2395 = vmatprep.subr.mxu1 %v2620_v8  ;;  %v2452_v62 = vpack.c.bf16 %v1917_v61, %v1916_v59 }
 0x7c2   :  { %2388 = vmatmul.mubr.msk.f32.vlgmr.msra.gmra.mrb[18].mxu1 %vm198_vm2, %v1432_v1  ;;  %v2010_v1 = vld [vmem:[%s3035_s11 + $0x10] sm:$0xff] }
 0x7c3   :  { %2397 = vmatprep.mubr.msk.f32.mxu1 %vm2621_vm1, %v2620_v8 }
 0x88d   :  { %v1268_v2 = vpop.f32.mrb[8].mxu0 }
 0x88e   :  { %v2374_v3 = vpop.f32.mrb[9].mxu0  ;;  %2382 = vmatprep.mubr.msk.f32.mxu0 %vm198_vm2, %v1268_v2 }
 0x88f   :  { %v2011_v3 = vld [vmem:[%s3035_s11 + $0x18] sm:$0xff] }
 0x891   :  { %v1344_v4 = vpop.f32.mrb[16].mxu1 }
 0x892   :  { %v2379_v6 = vpop.f32.mrb[17].mxu1  ;;  %2383 = vmatmul.mubr.msk.f32.vlgmr.msra.gmra.mrb[6].mxu0 %vm198_vm2, %v1344_v4  ;;  %v2460_v4 = vpack.c.bf16 %v2011_v3, %v2010_v1 }
 0x893   :  { %2391 = vmatpush3.xpose.msk.msra.mxu0 %vm198_vm2, %v1512_v63  ;;  %2392 = vmatprep.mubr.msk.f32.mxu0 %vm2621_vm1, %v2620_v8  ;;  %v2008_v63 = vld [vmem:[%s3035_s11] sm:$0xff] }
 0x894   :  { %2400 = vmatprep.subr.mxu0 %v2620_v8  ;;  %v2456_v2 = vpack.c.bf16 %v2009_v0, %v2008_v63  ;;  %v2012_v6 = vld [vmem:[%s3035_s11 + $0x20] sm:$0xff] }
 0x895   :  { %v1505_v10 = vpop.f32.mrb[18].mxu1 }
 0x896   :  { %v1506_v11 = vadd.f32 %v1505_v10, %v2802_v21  ;;  %v2389_v15 = vpop.f32.mrb[19].mxu1  ;;  %2393 = vmatmul.mubr.msk.f32.vlgmr.msra.gmra.mrb[10].mxu0 %vm198_vm2, %v1510_v9  ;;  %v2013_v9 = vld [vmem:[%s3035_s11 + $0x28] sm:$0xff] }
 0x897   :  { %2402 = vmatprep.mubr.msk.f32.mxu0 %vm2621_vm1, %v2620_v8  ;;  %v2464_v10 = vpack.c.bf16 %v2013_v9, %v2012_v6 }
 0x898   :  { %v1587_v16 = vsel %vm198_vm2, %v1506_v11, -inf }
 0x899   :  { %1588 = vmax.xlane.f32.xlu1 %v1587_v16 }
 0x926   :  { %v1589_v17 = vpop.xlane.xlu1 %1588 }
 0x927   :  { %v1593_v18 = vsub.f32 %v1506_v11, %v1589_v17 }
 0x929   :  { %v1595_v19 = vmul.f32 1.442695, %v1593_v18 }
 0x92b   :  { %2520 = vpow2.f32 %v1595_v19 }
 0x935   :  { %v2521_v21 = vpop.eup %2520 }
 0x936   :  { %v1599_v25 = vsel %vm198_vm2, %v2521_v21, 0.0 }
 0x969   :  { %v1583_v20 = vpop.f32.mrb[10].mxu0 }
 0x96a   :  { %v1584_v22 = vadd.f32 %v1583_v20, %v2808_v26  ;;  %v2394_v23 = vpop.f32.mrb[11].mxu0 }
 0x96c   :  { %v1590_v24 = vsel %vm198_vm2, %v1584_v22, -inf }
 0x96d   :  { %1591 = vmax.xlane.f32.xlu0 %v1590_v24 }
 0x971   :  { %1600 = vadd.xlane.f32.xlu0 %v1599_v25 }
 0x987   :  { %1609 = vrot.lane.b32.xlu0 %v2770_v12, %s2632_s26  ;;  %v192_v12 = vld [vmem:[%s3029_s5 + $0x18] sm:$0xff] }
 0x9fa   :  { %v1592_v8 = vpop.xlane.xlu0 %1591 }
 0x9fb   :  { %v1594_v14 = vsub.f32 %v1584_v22, %v1592_v8 }
 0x9fd   :  { %v1597_v27 = vmul.f32 1.442695, %v1594_v14 }
 0x9fe   :  { %v1601_v28 = vpop.xlane.xlu0 %1600 }
 0x9ff   :  { %2522 = vpow2.f32 %v1597_v27 }
 0xa00   :  { %2524 = vrcp.f32 %v1601_v28 }
 0xa02   :  { %v1610_v29 = vpop.permute.xlu0 %1609 }
 0xa03   :  { %2396 = vmatpush3.msra.mxu1 %v1610_v29 }
 0xa09   :  { %v2523_v26 = vpop.eup %2522 }
 0xa0a   :  { %v2525_v30 = vpop.eup %2524  ;;  %v1602_v31 = vsel %vm198_vm2, %v2523_v26, 0.0 }
 0xa0b   :  { %v1607_v32 = vmul.f32 %v2525_v30, %v2521_v21  ;;  %1603 = vadd.xlane.f32.xlu1 %v1602_v31 }
 0xa0d   :  { %2398 = vmatmul.mubr.msk.f32.vlgmr.msra.gmra.mrb[20].mxu1 %vm198_vm2, %v1607_v32 }
 0xa1c   :  { %1685 = vrot.lane.b32.xlu1 %v2773_v13, %s2632_s26 }
 0xa98   :  { %v1604_v33 = vpop.xlane.xlu1 %1603 }
 0xa99   :  { %2526 = vrcp.f32 %v1604_v33  ;;  %v2224_v33 = vld [vmem:[%s3032_s8] ss:$0 sm:$0xff] }
 0xa9c   :  { %v1686_v34 = vpop.permute.xlu1 %1685 }
 0xa9d   :  { %2401 = vmatpush3.msra.mxu0 %v1686_v34 }
 0xa9e   :  { %2405 = vmatprep.subr.mxu0 %v192_v12 }
 0xaa3   :  { %v2527_v35 = vpop.eup %2526 }
 0xaa4   :  { %v1608_v36 = vmul.f32 %v2527_v35, %v2523_v26  ;;  %v2223_v26 = vld [vmem:[%s3031_s7] ss:$0 sm:$0xff] }
 0xaa6   :  { %2403 = vmatmul.mubr.msk.f32.vlgmr.msra.gmra.mrb[12].mxu0 %vm198_vm2, %v1608_v36 }
 0xaa7   :  { %2406 = vmatpush3.msra.mxu0 %v192_v12 }
 0xaa8   :  { %2457 = vmatprep.subr.bf16.mxu0 %v2456_v2 }
 0xae0   :  { %v1681_v37 = vpop.f32.mrb[20].mxu1 }
 0xae1   :  { %v2399_v38 = vpop.f32.mrb[21].mxu1  ;;  %2407 = vmatprep.mubr.msk.f32.mxu0 %vm198_vm2, %v1681_v37  ;;  %v2014_v37 = vld [vmem:[%s3035_s11 + $0x30] sm:$0xff] }
 0xae2   :  { %v2015_v38 = vld [vmem:[%s3035_s11 + $0x38] sm:$0xff] }
 0xb79   :  { %v1757_v39 = vpop.f32.mrb[12].mxu0 }
 0xb7a   :  { %v2404_v13 = vpop.f32.mrb[13].mxu0  ;;  %2408 = vmatmul.mubr.msk.f32.vlgmr.msra.gmra.mrb[6].mxu0 %vm198_vm2, %v1757_v39  ;;  %v2468_v39 = vpack.c.bf16 %v2015_v38, %v2014_v37 }
 0xb7b   :  { %2459 = vmatpush3.bf16.msra.mxu0 %v2456_v2  ;;  %v2225_v13 = vld [vmem:[%s3034_s10] ss:$0 sm:$0xff] }
 0xb7c   :  { %2461 = vmatprep.subr.bf16.mxu0 %v2460_v4 }
 0xb7f   :  { %2463 = vmatpush3.bf16.msra.mxu0 %v2460_v4 }
 0xb80   :  { %2465 = vmatprep.subr.bf16.mxu0 %v2464_v10 }
 0xb83   :  { %2467 = vmatpush3.bf16.msra.mxu0 %v2464_v10 }
 0xb84   :  { %2469 = vmatprep.subr.bf16.mxu0 %v2468_v39 }
 0xb87   :  { %2471 = vmatpush3.bf16.msra.mxu0 %v2468_v39 }
 0xc4d   :  { %v2409_v41 = vpop.f32.mrb[6].mxu0 }
 0xc4e   :  { %v1852_v42 = vadd.f32 %v2409_v41, %v2222_v40  ;;  %v1833_v43 = vpop.f32.mrb[7].mxu0 }
 0xc4f   :  { %v1851_v44 = vadd.f32 %v2222_v40, %v1833_v43 }
 0xc50   :  { %v1854_v45 = vadd.f32 %v1852_v42, %v2757_v7 }
 0xc51   :  { %v1853_v46 = vadd.f32 %v1851_v44, %v2753_v5  ;;  %v1914_v5 = vld [vmem:[%s3033_s9] sm:$0xff] }
 0xc52   :  { %v1860_v47 = vsel %vm107_vm0, %v1854_v45, 0.0  ;;  %v2448_v60 = vpack.c.bf16 %v1915_v58, %v1914_v5 }
 0xc53   :  { %1861 = vadd.xlane.f32.xlu0 %v1860_v47  ;;  %v1857_v48 = vsel %vm107_vm0, %v1853_v46, 0.0 }
 0xc54   :  { %1858 = vadd.xlane.f32.xlu1 %v1857_v48  ;;  %2449 = vmatprep.subr.bf16.mxu1 %v2448_v60 }
 0xc55   :  { %2451 = vmatpush3.bf16.msra.mxu1 %v2448_v60 }
 0xc56   :  { %2453 = vmatprep.subr.bf16.mxu1 %v2452_v62 }
 0xc59   :  { %2455 = vmatpush3.bf16.msra.mxu1 %v2452_v62 }
 0xce0   :  { %v1862_v49 = vpop.xlane.xlu0 %1861 }
 0xce1   :  { %v1865_v50 = vmul.f32 0.03125, %v1862_v49  ;;  %v1859_v51 = vpop.xlane.xlu1 %1858 }
 0xce2   :  { %v1864_v52 = vmul.f32 0.03125, %v1859_v51 }
 0xce3   :  { %v1867_v54 = vsub.f32 %v1854_v45, %v1865_v50 }
 0xce4   :  { %v1866_v55 = vsub.f32 %v1853_v46, %v1864_v52  ;;  %v2228_v46 = vld [vmem:[%s3036_s12] ss:$0 sm:$0xff] }
 0xce5   :  { %v1869_v53 = vmul.f32 %v1867_v54, %v1867_v54 }
 0xce6   :  { %v1868_v56 = vmul.f32 %v1866_v55, %v1866_v55 }
 0xce7   :  { %v1873_v57 = vsel %vm107_vm0, %v1869_v53, 0.0 }
 0xce8   :  { %1874 = vadd.xlane.f32.xlu1 %v1873_v57  ;;  %v1870_v7 = vsel %vm107_vm0, %v1868_v56, 0.0 }
 0xce9   :  { %1871 = vadd.xlane.f32.xlu0 %v1870_v7 }
 0xd75   :  { %v1875_v11 = vpop.xlane.xlu1 %1874 }
 0xd76   :  { %v1877_v15 = vmul.f32 0.03125, %v1875_v11  ;;  %v1872_v16 = vpop.xlane.xlu0 %1871 }
 0xd77   :  { %v1876_v17 = vmul.f32 0.03125, %v1872_v16 }
 0xd78   :  { %v1879_v18 = vadd.f32 1e-05, %v1877_v15 }
 0xd79   :  { %v1878_v19 = vadd.f32 1e-05, %v1876_v17 }
 0xd7a   :  { %2528 = vrsqrt.f32 %v1879_v18  ;;  %vm1889_vm3 = vcmp.eq.f32.partialorder %v1879_v18, inf  ;;  %v1892_v24 = vand.u32 2147483648, %v1879_v18  ;;  %vm1891_vm4 = vcmp.eq.f32.partialorder %v1879_v18, 0.0 }
 0xd7b   :  { %2530 = vrsqrt.f32 %v1878_v19  ;;  %vm1882_vm5 = vcmp.eq.f32.partialorder %v1878_v19, inf  ;;  %v1885_v8 = vand.u32 2147483648, %v1878_v19  ;;  %vm1884_vm6 = vcmp.eq.f32.partialorder %v1878_v19, 0.0 }
 0xd84   :  { %v2529_v20 = vpop.eup %2528 }
 0xd85   :  { %v2531_v22 = vpop.eup %2530  ;;  %v1888_v23 = vmul.f32 %v2529_v20, %v1879_v18 }
 0xd86   :  { %v1881_v21 = vmul.f32 %v2531_v22, %v1878_v19 }
 0xd87   :  { %v1890_v25 = vsel %vm1889_vm3, %v1879_v18, %v1888_v23  ;;  %v2231_v23 = vld [vmem:[%s3037_s13] ss:$0 sm:$0xff] }
 0xd88   :  { %v1893_v14 = vsel %vm1891_vm4, %v1892_v24, %v1890_v25  ;;  %v1883_v27 = vsel %vm1882_vm5, %v1878_v19, %v1881_v21  ;;  %v2232_v25 = vld [vmem:[%s3038_s14] ss:$0 sm:$0xff] }
 0xd89   :  { %2532 = vrcp.f32 %v1893_v14  ;;  %v1886_v28 = vsel %vm1884_vm6, %v1885_v8, %v1883_v27 }
 0xd8a   :  { %2534 = vrcp.f32 %v1886_v28 }
 0xd93   :  { %v2533_v29 = vpop.eup %2532 }
 0xd94   :  { %v2535_v30 = vpop.eup %2534  ;;  %v1897_v31 = vmul.f32 %v2533_v29, %v1867_v54 }
 0xd95   :  { %v1895_v32 = vmul.f32 %v2535_v30, %v1866_v55 }
 0xd96   :  { %v1905_v12 = vmul.f32 %v2223_v26, %v1897_v31 }
 0xd97   :  { %v1904_v34 = vmul.f32 %v2223_v26, %v1895_v32 }
 0xd98   :  { %v1913_v36 = vadd.f32 %v2224_v33, %v1905_v12 }
 0xd99   :  { %v1912_v35 = vadd.f32 %v2224_v33, %v1904_v34 }
 0xd9b   :  { %2418 = vmatprep.mubr.msk.f32.mxu1 %vm107_vm0, %v1912_v35 }
 0xd9c   :  { %2419 = vmatmul.mubr.msk.f32.vlgmr.msra.gmra.mrb[22].mxu1 %vm107_vm0, %v1913_v36 }
 0xe6f   :  { %v2420_v40 = vpop.f32.mrb[22].mxu1 }
 0xe70   :  { %v2003_v41 = vadd.f32 %v2420_v40, %v2225_v13  ;;  %v1997_v42 = vpop.f32.mrb[23].mxu1 }
 0xe71   :  { %v1998_v43 = vadd.f32 %v2225_v13, %v1997_v42 }
 0xe72   :  { %v2007_v45 = vmax.f32 %v2003_v41, 0.0 }
 0xe73   :  { %v2006_v44 = vmax.f32 %v1998_v43, 0.0 }
 0xe75   :  { %2437 = vmatprep.mubr.msk.f32.mxu0 %vm2023_vm7, %v2006_v44 }
 0xe76   :  { %2438 = vmatmul.mubr.msk.f32.vlgmr.msra.gmra.mrb[14].mxu0 %vm2023_vm7, %v2007_v45 }
 0xf49   :  { %v2439_v47 = vpop.f32.mrb[14].mxu0 }
 0xf4a   :  { %v2102_v48 = vadd.f32 %v2439_v47, %v2228_v46  ;;  %v2096_v49 = vpop.f32.mrb[15].mxu0 }
 0xf4b   :  { %v2097_v50 = vadd.f32 %v2228_v46, %v2096_v49 }
 0xf4c   :  { %v2106_v51 = vadd.f32 %v2102_v48, %v1913_v36 }
 0xf4d   :  { %v2105_v52 = vadd.f32 %v2097_v50, %v1912_v35 }
 0xf4e   :  { %v2112_v54 = vsel %vm107_vm0, %v2106_v51, 0.0 }
 0xf4f   :  { %2113 = vadd.xlane.f32.xlu1 %v2112_v54  ;;  %v2109_v55 = vsel %vm107_vm0, %v2105_v52, 0.0 }
 0xf50   :  { %2110 = vadd.xlane.f32.xlu0 %v2109_v55 }
 0xfdc   :  { %v2114_v53 = vpop.xlane.xlu1 %2113 }
 0xfdd   :  { %v2116_v56 = vmul.f32 0.03125, %v2114_v53  ;;  %v2111_v57 = vpop.xlane.xlu0 %2110 }
 0xfde   :  { %v2115_v7 = vmul.f32 0.03125, %v2111_v57 }
 0xfdf   :  { %v2118_v5 = vsub.f32 %v2106_v51, %v2116_v56 }
 0xfe0   :  { %v2117_v58 = vsub.f32 %v2105_v52, %v2115_v7 }
 0xfe1   :  { %v2120_v59 = vmul.f32 %v2118_v5, %v2118_v5 }
 0xfe2   :  { %v2119_v60 = vmul.f32 %v2117_v58, %v2117_v58 }
 0xfe3   :  { %v2124_v61 = vsel %vm107_vm0, %v2120_v59, 0.0 }
 0xfe4   :  { %2125 = vadd.xlane.f32.xlu1 %v2124_v61  ;;  %v2121_v62 = vsel %vm107_vm0, %v2119_v60, 0.0 }
 0xfe5   :  { %2122 = vadd.xlane.f32.xlu0 %v2121_v62 }
0x1071   :  { %v2126_v63 = vpop.xlane.xlu1 %2125 }
0x1072   :  { %v2128_v0 = vmul.f32 0.03125, %v2126_v63  ;;  %v2123_v1 = vpop.xlane.xlu0 %2122 }
0x1073   :  { %v2127_v2 = vmul.f32 0.03125, %v2123_v1 }
0x1074   :  { %v2130_v3 = vadd.f32 1e-05, %v2128_v0 }
0x1075   :  { %v2129_v4 = vadd.f32 1e-05, %v2127_v2 }
0x1076   :  { %2536 = vrsqrt.f32 %v2130_v3  ;;  %vm2140_vm8 = vcmp.eq.f32.partialorder %v2130_v3, inf  ;;  %v2143_v11 = vand.u32 2147483648, %v2130_v3  ;;  %vm2142_vm9 = vcmp.eq.f32.partialorder %v2130_v3, 0.0 }
0x1077   :  { %2538 = vrsqrt.f32 %v2129_v4  ;;  %vm2133_vm10 = vcmp.eq.f32.partialorder %v2129_v4, inf  ;;  %v2136_v17 = vand.u32 2147483648, %v2129_v4  ;;  %vm2135_vm11 = vcmp.eq.f32.partialorder %v2129_v4, 0.0 }
0x1080   :  { %v2537_v6 = vpop.eup %2536 }
0x1081   :  { %v2539_v9 = vpop.eup %2538  ;;  %v2139_v10 = vmul.f32 %v2537_v6, %v2130_v3 }
0x1082   :  { %v2132_v15 = vmul.f32 %v2539_v9, %v2129_v4 }
0x1083   :  { %v2141_v16 = vsel %vm2140_vm8, %v2130_v3, %v2139_v10 }
0x1084   :  { %v2144_v18 = vsel %vm2142_vm9, %v2143_v11, %v2141_v16  ;;  %v2134_v19 = vsel %vm2133_vm10, %v2129_v4, %v2132_v15 }
0x1085   :  { %2540 = vrcp.f32 %v2144_v18  ;;  %v2137_v20 = vsel %vm2135_vm11, %v2136_v17, %v2134_v19 }
0x1086   :  { %2542 = vrcp.f32 %v2137_v20 }
0x108f   :  { %v2541_v22 = vpop.eup %2540 }
0x1090   :  { %v2543_v24 = vpop.eup %2542  ;;  %v2148_v21 = vmul.f32 %v2541_v22, %v2118_v5 }
0x1091   :  { %v2146_v8 = vmul.f32 %v2543_v24, %v2117_v58 }
0x1092   :  { %v2156_v14 = vmul.f32 %v2231_v23, %v2148_v21 }
0x1093   :  { %v2155_v27 = vmul.f32 %v2231_v23, %v2146_v8 }
0x1094   :  { %v2164_v28 = vadd.f32 %v2232_v25, %v2156_v14 }
0x1095   :  { %v2163_v29 = vadd.f32 %v2232_v25, %v2155_v27 }
0x1096   :  { %2166 = vst.msk [vmem:[#allocation7 + $0x8] sm:$0xff] %vm107_vm0, %v2164_v28 }
0x1097   :  { %2165 = vst.msk [vmem:[#allocation7] sm:$0xff] %vm107_vm0, %v2163_v29 }
0x1098   :  { %2599 = shalt.err (!%p2596_p6)
}
0x1099   :  { %s2600_s24 = scalar_lea.hbm %s3039_s15, 256 }
0x109a   :  { %p2601_p7 = scmp.ne.s32.totalorder %s3039_s15, %s2600_s24  ;;  %p2604_p8 = scmp.lt.u32.totalorder %s2600_s24, %s3039_s15 }
0x109c   :  { %p2606_p9 = pnand %p2604_p8, %p2601_p7 }
0x109e   :  { %2609 = shalt.err (!%p2606_p9)
}
0x109f   :  { %2178 = dma.vmem_to_hbm [thread:$0]  %s2173_s3, 256, %s3039_s15, [#allocation4], %s2617_s28, %s2617_s28, %s2618_s29  }
0x10a0   :  { %2614 = dma.done.wait [#allocation4], 256  }
0x10a1   :  { %2615 = vsyncadd [#allocation4], 4294967040 }
0x10a2   :  { %2182 = vsyncpa [#allocation3], 1 }
0x10a3   :  { %2183 = vsyncpa [#allocation6], 1 }
0x10a4   :  { %2184 = vsyncpa [#allocation4], 1 }

</bundles_post_ra>
